<compile_context>
chip_gen: v7x
topology: tpu7x:2x2x1
jax: 0.10.0
libtpu: 0.0.40
codegen_flags: <defaults>
</compile_context>

<pallas_src>
import functools
import numpy as np
import jax
import jax.numpy as jnp
from jax.experimental import pallas as pl
from jax.experimental.pallas import tpu as pltpu

PYCONV_KERNELS = (1, 3, 5, 7)
PYCONV_GROUPS = (1, 2, 4, 8)
BN_EPS = 1e-5
_KMAX = max(PYCONV_KERNELS)          # shared 7x7 im2col window


# ----------------------------- Pallas kernels ---------------------------------------------


def _pyconv_matmul_kernel(p_ref, wbd_ref, wout_ref, y_ref, stats_ref):
    """Pass 1 (per row-tile): one block-sparse matmul over the shared 7x7 im2col columns
    (all pyramid levels + groups at once), per-level ReLU, 1x1 'to_out' matmul, lane-dense
    bf16 store of y, plus per-tile BN partial statistics (f32)."""
    tm = p_ref.shape[0]
    rows = y_ref.shape[0]            # = tm // 8
    cout = wout_ref.shape[1]

    z = jnp.dot(p_ref[...], wbd_ref[...], preferred_element_type=jnp.float32)   # (tm, 4*cmid)
    z = jnp.maximum(z, 0.0)                                                      # per-level ReLU
    y = jnp.dot(z.astype(jnp.bfloat16), wout_ref[...],
                preferred_element_type=jnp.float32)                              # (tm, cout) f32

    # Lane-dense store: pack 8 contiguous row-chunks side by side -> (tm//8, 8*cout) bf16.
    yb = y.astype(jnp.bfloat16)
    for chunk in range(8):
        y_ref[:, chunk * cout:(chunk + 1) * cout] = yb[chunk * rows:(chunk + 1) * rows, :]

    # Per-tile BN partials: sum and tile-centered sum of squares (merged exactly host-side).
    s_sum = jnp.sum(y, axis=0, keepdims=True)                    # (1, cout)
    mu = s_sum * (1.0 / tm)
    q = jnp.sum((y - mu) ** 2, axis=0, keepdims=True)            # (1, cout)
    stats_ref[...] = jnp.concatenate([s_sum, q], axis=0).reshape(1, 2, cout)


def _bn_relu_kernel(y_ref, scale_ref, bias_ref, o_ref):
    """Pass 2: folded BatchNorm affine (y*scale + bias) + ReLU on the lane-dense bf16 slab."""
    o_ref[...] = jnp.maximum(
        y_ref[...].astype(jnp.float32) * scale_ref[...] + bias_ref[...], 0.0)


# ----------------------------- Host-side glue ---------------------------------------------


def _im2col_7x7_cmajor(x_nhwc):
    """Single 7x7 im2col (SAME padding) -> (N*H*W, C*49), columns ordered (c, dy, dx)."""
    k = _KMAX
    p = k // 2
    n, h, w, c = x_nhwc.shape
    xp = jnp.pad(x_nhwc, ((0, 0), (p, p), (p, p), (0, 0)))
    shifts = [xp[:, dy:dy + h, dx:dx + w, :] for dy in range(k) for dx in range(k)]
    s = jnp.stack(shifts, axis=3)                         # (n, h, w, k*k, c)
    return jnp.transpose(s, (0, 1, 2, 4, 3)).reshape(n * h * w, c * k * k)


def pack_pyconv_params(level_weights, w_out_oihw):
    """Pack parameters ONCE (host-side numpy): scatter every level's grouped weights into one
    block-sparse (cin*49, 4*cmid) matrix aligned with the shared 7x7 im2col columns."""
    lw0 = np.asarray(level_weights[0])
    cmid, cin = lw0.shape[0], lw0.shape[1]               # level 0 has groups=1
    ncols = len(PYCONV_KERNELS) * cmid
    w_bd = np.zeros((cin, _KMAX, _KMAX, ncols), np.float32)
    for lvl, (wl, k, g) in enumerate(zip(level_weights, PYCONV_KERNELS, PYCONV_GROUPS)):
        wl = np.asarray(wl)                               # (cmid, cin//g, k, k)
        cin_g, cmid_g, off = cin // g, cmid // g, (_KMAX - k) // 2
        for gi in range(g):
            blk = np.transpose(wl[gi * cmid_g:(gi + 1) * cmid_g], (1, 2, 3, 0))  # (cin_g,k,k,cmid_g)
            w_bd[gi * cin_g:(gi + 1) * cin_g, off:off + k, off:off + k,
                 lvl * cmid + gi * cmid_g: lvl * cmid + (gi + 1) * cmid_g] = blk
    w_bd = jnp.asarray(w_bd.reshape(cin * _KMAX * _KMAX, ncols), jnp.bfloat16)
    w_out = jnp.asarray(np.transpose(np.asarray(w_out_oihw)[:, :, 0, 0]), jnp.bfloat16)
    return w_bd, w_out                                    # (cin*49, 4*cmid), (4*cmid, cout)


@functools.partial(jax.jit, static_argnames=("tm",))
def pyconv2d_forward(x_nchw, w_bd, w_out, gamma, beta, *, tm=None):
    n, cin, h, w = x_nchw.shape
    ktot, ncols = w_bd.shape
    cout = w_out.shape[1]
    nhw = n * h * w

    if tm is None:                       # prefer >=4 grid steps (pipelining / megacore)
        tm = 128
        for cand in (512, 256):
            if nhw >= 4 * cand:
                tm = cand
                break
    assert tm % 8 == 0

    x_nhwc = jnp.transpose(x_nchw, (0, 2, 3, 1))
    patches = _im2col_7x7_cmajor(x_nhwc).astype(jnp.bfloat16)        # (nhw, cin*49)

    n_tiles = pl.cdiv(nhw, tm)
    nhw_pad = n_tiles * tm
    if nhw_pad != nhw:
        # Zero pad rows -> y rows are exactly 0; their effect on BN stats is removed exactly below.
        patches = jnp.pad(patches, ((0, nhw_pad - nhw), (0, 0)))

    rows = tm // 8
    lanes = 8 * cout
    flops = 2 * nhw_pad * (ktot * ncols + ncols * cout)
    bytes_accessed = (nhw_pad * ktot * 2 + ktot * ncols * 2 + ncols * cout * 2
                      + nhw_pad * cout * 2 + n_tiles * 2 * cout * 4)

    y_dense, stats = pl.pallas_call(
        _pyconv_matmul_kernel,
        out_shape=(jax.ShapeDtypeStruct((nhw_pad // 8, lanes), jnp.bfloat16),
                   jax.ShapeDtypeStruct((n_tiles, 2, cout), jnp.float32)),
        grid=(n_tiles,),
        in_specs=[pl.BlockSpec((tm, ktot), lambda i: (i, 0)),
                  pl.BlockSpec(w_bd.shape, lambda i: (0, 0)),
                  pl.BlockSpec(w_out.shape, lambda i: (0, 0))],
        out_specs=(pl.BlockSpec((rows, lanes), lambda i: (i, 0)),
                   pl.BlockSpec((1, 2, cout), lambda i: (i, 0, 0))),
        compiler_params=pltpu.CompilerParams(
            dimension_semantics=("parallel",),
            vmem_limit_bytes=32 * 1024 * 1024),
        cost_estimate=pl.CostEstimate(flops=flops, transcendentals=0,
                                      bytes_accessed=bytes_accessed),
    )(patches, w_bd, w_out)

    # ---- Finalize global BN statistics (tiny O(cout) math, numerically-stable merge) ----
    sums = stats[:, 0, :]                                 # (n_tiles, cout)
    qs = stats[:, 1, :]                                   # tile-centered M2
    tile_mu = sums / tm
    total = jnp.sum(sums, axis=0)
    mu_pad = total / nhw_pad
    m2_pad = jnp.sum(qs, axis=0) + tm * jnp.sum((tile_mu - mu_pad) ** 2, axis=0)
    mean = total / nhw
    n_zero = nhw_pad - nhw
    m2 = m2_pad - nhw * (mean - mu_pad) ** 2 - n_zero * mu_pad ** 2   # remove zero-pad rows
    var = m2 / nhw                                        # biased variance (training-mode BN)
    scale = gamma * jax.lax.rsqrt(var + BN_EPS)
    bias = beta - mean * scale

    # ---- Pass 2: BN affine + ReLU over the lane-dense slab, large mem-bound blocks ----
    rows2 = nhw_pad // 8
    rb = min(rows2, 4096)
    scale_l = jnp.tile(scale, 8).reshape(1, lanes).astype(jnp.float32)
    bias_l = jnp.tile(bias, 8).reshape(1, lanes).astype(jnp.float32)
    out2 = pl.pallas_call(
        _bn_relu_kernel,
        out_shape=jax.ShapeDtypeStruct((rows2, lanes), jnp.float32),
        grid=(pl.cdiv(rows2, rb),),
        in_specs=[pl.BlockSpec((rb, lanes), lambda i: (i, 0)),
                  pl.BlockSpec((1, lanes), lambda i: (0, 0)),
                  pl.BlockSpec((1, lanes), lambda i: (0, 0))],
        out_specs=pl.BlockSpec((rb, lanes), lambda i: (i, 0)),
        compiler_params=pltpu.CompilerParams(dimension_semantics=("parallel",)),
    )(y_dense, scale_l, bias_l)

    # Undo the per-tile row packing (fuses into the final NHWC->NCHW transpose for free).
    out = out2.reshape(n_tiles, rows, 8, cout)
    out = jnp.transpose(out, (0, 2, 1, 3)).reshape(nhw_pad, cout)[:nhw]
    return jnp.transpose(out.reshape(n, h, w, cout), (0, 3, 1, 2))   # back to NCHW


# ----------------------------- Pure-JAX reference -----------------------------------------


def pyconv2d_reference(x_nchw, level_weights, w_out_oihw, gamma, beta):
    """Pure-JAX reference mirroring the PyTorch forward (training-mode BN)."""
    outs = []
    for wl, k, g in zip(level_weights, PYCONV_KERNELS, PYCONV_GROUPS):
        y = jax.lax.conv_general_dilated(
            x_nchw, wl, window_strides=(1, 1),
            padding=[(k // 2, k // 2)] * 2,
            dimension_numbers=("NCHW", "OIHW", "NCHW"),
            feature_group_count=g)
        outs.append(jnp.maximum(y, 0.0))
    cat = jnp.concatenate(outs, axis=1)
    y = jnp.einsum("nchw,fc->nfhw", cat, w_out_oihw[:, :, 0, 0])
    mean = jnp.mean(y, axis=(0, 2, 3), keepdims=True)
    var = jnp.mean((y - mean) ** 2, axis=(0, 2, 3), keepdims=True)
    y = (y - mean) / jnp.sqrt(var + BN_EPS) * gamma.reshape(1, -1, 1, 1) + beta.reshape(1, -1, 1, 1)
    return jnp.maximum(y, 0.0)


if __name__ == "__main__":
    # groups=8 requires Cin % 8 == 0 and (Cout // 2) % 8 == 0  ->  Cin = 8, Cout = 16.
    N, CIN, H, W = 2, 8, 16, 16
    COUT = 16
    CMID = COUT // 2

    key = jax.random.PRNGKey(0)
    keys = jax.random.split(key, 6)

    level_weights = []
    for i, (k, g) in enumerate(zip(PYCONV_KERNELS, PYCONV_GROUPS)):
        fan_in = (CIN // g) * k * k
        level_weights.append(
            jax.random.normal(keys[i], (CMID, CIN // g, k, k), jnp.float32) / np.sqrt(fan_in))
    w_out_oihw = jax.random.normal(keys[4], (COUT, len(PYCONV_KERNELS) * CMID, 1, 1),
                                   jnp.float32) * 0.1
    gamma = jnp.ones((COUT,), jnp.float32)   # BatchNorm2d default affine init
    beta = jnp.zeros((COUT,), jnp.float32)

    x = jax.random.normal(keys[5], (N, CIN, H, W), jnp.float32)

    w_bd, w_out = pack_pyconv_params(level_weights, w_out_oihw)      # packed once, host-side
    out = pyconv2d_forward(x, w_bd, w_out, gamma, beta)
    out = jax.block_until_ready(out)

    ref = pyconv2d_reference(x, level_weights, w_out_oihw, gamma, beta)
    # bf16 patches / z / intermediate y vs f32 reference -> bf16-level tolerance.
    np.testing.assert_allclose(np.asarray(out), np.asarray(ref), atol=4e-2, rtol=4e-2)
    print("KERNEL_OK")
</pallas_src>

<mosaic_0001>
module attributes {stable_mosaic.version = 11 : i64} {
  func.func @_pyconv_matmul_kernel(%arg0: i32, %arg1: memref<128x392xbf16, #tpu.memory_space<vmem>>, %arg2: memref<392x32xbf16, #tpu.memory_space<vmem>>, %arg3: memref<32x16xbf16, #tpu.memory_space<vmem>>, %arg4: memref<16x128xbf16, #tpu.memory_space<vmem>>, %arg5: memref<1x2x16xf32, #tpu.memory_space<vmem>>) attributes {dimension_semantics = [#tpu.dimension_semantics<parallel>], iteration_bounds = array<i64: 4>, scalar_prefetch = 0 : i64, scratch_operands = 0 : i64, tpu.core_type = #tpu.core_type<tc>, window_params = [{transform_indices = @transform_0, window_bounds = array<i64: 128, 392>}, {pipeline_mode = #tpu.pipeline_mode<synchronous>, transform_indices = @transform_1, window_bounds = array<i64: 392, 32>}, {pipeline_mode = #tpu.pipeline_mode<synchronous>, transform_indices = @transform_2, window_bounds = array<i64: 32, 16>}, {transform_indices = @transform_3, window_bounds = array<i64: 16, 128>}, {transform_indices = @transform_4, window_bounds = array<i64: 1, 2, 16>}]} {
    %c0 = arith.constant 0 : index
    %c0_0 = arith.constant 0 : index
    %0 = vector.load %arg1[%c0, %c0_0] : memref<128x392xbf16, #tpu.memory_space<vmem>>, vector<128x392xbf16>
    %c0_1 = arith.constant 0 : index
    %c0_2 = arith.constant 0 : index
    %1 = vector.load %arg2[%c0_1, %c0_2] : memref<392x32xbf16, #tpu.memory_space<vmem>>, vector<392x32xbf16>
    %cst = arith.constant dense<0.000000e+00> : vector<128x32xf32>
    %2 = tpu.matmul %0, %1, %cst {dimension_numbers = #tpu.dot_dimension_numbers<[1], [0], [0], [1], [0, 0, 1, 1], [], []>} : vector<128x392xbf16>, vector<392x32xbf16>, vector<128x32xf32> -> vector<128x32xf32>
    %cst_3 = arith.constant 0.000000e+00 : f32
    %3 = vector.broadcast %cst_3 : f32 to vector<128x32xf32>
    %4 = arith.maximumf %2, %3 : vector<128x32xf32>
    %5 = arith.truncf %4 : vector<128x32xf32> to vector<128x32xbf16>
    %c0_4 = arith.constant 0 : index
    %c0_5 = arith.constant 0 : index
    %6 = vector.load %arg3[%c0_4, %c0_5] : memref<32x16xbf16, #tpu.memory_space<vmem>>, vector<32x16xbf16>
    %cst_6 = arith.constant dense<0.000000e+00> : vector<128x16xf32>
    %7 = tpu.matmul %5, %6, %cst_6 {dimension_numbers = #tpu.dot_dimension_numbers<[1], [0], [0], [1], [0, 0, 1, 1], [], []>} : vector<128x32xbf16>, vector<32x16xbf16>, vector<128x16xf32> -> vector<128x16xf32>
    %8 = arith.truncf %7 : vector<128x16xf32> to vector<128x16xbf16>
    %9 = vector.extract_strided_slice %8 {offsets = [0, 0], sizes = [16, 16], strides = [1, 1]} : vector<128x16xbf16> to vector<16x16xbf16>
    %c0_7 = arith.constant 0 : index
    %c0_8 = arith.constant 0 : index
    %10 = vector.load %arg4[%c0_7, %c0_8] : memref<16x128xbf16, #tpu.memory_space<vmem>>, vector<16x16xbf16>
    tpu.vector_store %arg4[%c0_7, %c0_8], %9 {strides = array<i32>} : memref<16x128xbf16, #tpu.memory_space<vmem>>, vector<16x16xbf16>,
    %11 = vector.extract_strided_slice %8 {offsets = [16, 0], sizes = [16, 16], strides = [1, 1]} : vector<128x16xbf16> to vector<16x16xbf16>
    %c0_9 = arith.constant 0 : index
    %c16 = arith.constant 16 : index
    %12 = vector.load %arg4[%c0_9, %c16] : memref<16x128xbf16, #tpu.memory_space<vmem>>, vector<16x16xbf16>
    tpu.vector_store %arg4[%c0_9, %c16], %11 {strides = array<i32>} : memref<16x128xbf16, #tpu.memory_space<vmem>>, vector<16x16xbf16>,
    %13 = vector.extract_strided_slice %8 {offsets = [32, 0], sizes = [16, 16], strides = [1, 1]} : vector<128x16xbf16> to vector<16x16xbf16>
    %c0_10 = arith.constant 0 : index
    %c32 = arith.constant 32 : index
    %14 = vector.load %arg4[%c0_10, %c32] : memref<16x128xbf16, #tpu.memory_space<vmem>>, vector<16x16xbf16>
    tpu.vector_store %arg4[%c0_10, %c32], %13 {strides = array<i32>} : memref<16x128xbf16, #tpu.memory_space<vmem>>, vector<16x16xbf16>,
    %15 = vector.extract_strided_slice %8 {offsets = [48, 0], sizes = [16, 16], strides = [1, 1]} : vector<128x16xbf16> to vector<16x16xbf16>
    %c0_11 = arith.constant 0 : index
    %c48 = arith.constant 48 : index
    %16 = vector.load %arg4[%c0_11, %c48] : memref<16x128xbf16, #tpu.memory_space<vmem>>, vector<16x16xbf16>
    tpu.vector_store %arg4[%c0_11, %c48], %15 {strides = array<i32>} : memref<16x128xbf16, #tpu.memory_space<vmem>>, vector<16x16xbf16>,
    %17 = vector.extract_strided_slice %8 {offsets = [64, 0], sizes = [16, 16], strides = [1, 1]} : vector<128x16xbf16> to vector<16x16xbf16>
    %c0_12 = arith.constant 0 : index
    %c64 = arith.constant 64 : index
    %18 = vector.load %arg4[%c0_12, %c64] : memref<16x128xbf16, #tpu.memory_space<vmem>>, vector<16x16xbf16>
    tpu.vector_store %arg4[%c0_12, %c64], %17 {strides = array<i32>} : memref<16x128xbf16, #tpu.memory_space<vmem>>, vector<16x16xbf16>,
    %19 = vector.extract_strided_slice %8 {offsets = [80, 0], sizes = [16, 16], strides = [1, 1]} : vector<128x16xbf16> to vector<16x16xbf16>
    %c0_13 = arith.constant 0 : index
    %c80 = arith.constant 80 : index
    %20 = vector.load %arg4[%c0_13, %c80] : memref<16x128xbf16, #tpu.memory_space<vmem>>, vector<16x16xbf16>
    tpu.vector_store %arg4[%c0_13, %c80], %19 {strides = array<i32>} : memref<16x128xbf16, #tpu.memory_space<vmem>>, vector<16x16xbf16>,
    %21 = vector.extract_strided_slice %8 {offsets = [96, 0], sizes = [16, 16], strides = [1, 1]} : vector<128x16xbf16> to vector<16x16xbf16>
    %c0_14 = arith.constant 0 : index
    %c96 = arith.constant 96 : index
    %22 = vector.load %arg4[%c0_14, %c96] : memref<16x128xbf16, #tpu.memory_space<vmem>>, vector<16x16xbf16>
    tpu.vector_store %arg4[%c0_14, %c96], %21 {strides = array<i32>} : memref<16x128xbf16, #tpu.memory_space<vmem>>, vector<16x16xbf16>,
    %23 = vector.extract_strided_slice %8 {offsets = [112, 0], sizes = [16, 16], strides = [1, 1]} : vector<128x16xbf16> to vector<16x16xbf16>
    %c0_15 = arith.constant 0 : index
    %c112 = arith.constant 112 : index
    %24 = vector.load %arg4[%c0_15, %c112] : memref<16x128xbf16, #tpu.memory_space<vmem>>, vector<16x16xbf16>
    tpu.vector_store %arg4[%c0_15, %c112], %23 {strides = array<i32>} : memref<16x128xbf16, #tpu.memory_space<vmem>>, vector<16x16xbf16>,
    %cst_16 = arith.constant dense<0.000000e+00> : vector<16xf32>
    %25 = vector.multi_reduction <add>, %7, %cst_16 [0] : vector<128x16xf32> to vector<16xf32>
    %26 = vector.shape_cast %25 : vector<16xf32> to vector<1x16xf32>
    %cst_17 = arith.constant 7.812500e-03 : f32
    %27 = vector.broadcast %cst_17 : f32 to vector<1x16xf32>
    %28 = arith.mulf %26, %27 : vector<1x16xf32>
    %29 = vector.broadcast %28 : vector<1x16xf32> to vector<128x16xf32>
    %30 = arith.subf %7, %29 : vector<128x16xf32>
    %31 = arith.mulf %30, %30 : vector<128x16xf32>
    %cst_18 = arith.constant dense<0.000000e+00> : vector<16xf32>
    %32 = vector.multi_reduction <add>, %31, %cst_18 [0] : vector<128x16xf32> to vector<16xf32>
    %33 = vector.shape_cast %32 : vector<16xf32> to vector<1x16xf32>
    %34 = tpu.concatenate %26, %33 in 0 : vector<1x16xf32>, vector<1x16xf32> -> vector<2x16xf32>
    %35 = vector.shape_cast %34 : vector<2x16xf32> to vector<1x2x16xf32>
    %c0_19 = arith.constant 0 : index
    %c0_20 = arith.constant 0 : index
    %c0_21 = arith.constant 0 : index
    %36 = vector.load %arg5[%c0_19, %c0_20, %c0_21] : memref<1x2x16xf32, #tpu.memory_space<vmem>>, vector<1x2x16xf32>
    tpu.vector_store %arg5[%c0_19, %c0_20, %c0_21], %35 {strides = array<i32>} : memref<1x2x16xf32, #tpu.memory_space<vmem>>, vector<1x2x16xf32>,
    return
  }
  func.func @transform_0(%arg0: i32) -> (i32, i32) {
    %c0_i32 = arith.constant 0 : i32
    %c0_i32_0 = arith.constant 0 : i32
    return %arg0, %c0_i32 : i32, i32
  }
  func.func @transform_1(%arg0: i32) -> (i32, i32) {
    %c0_i32 = arith.constant 0 : i32
    %c0_i32_0 = arith.constant 0 : i32
    %c0_i32_1 = arith.constant 0 : i32
    return %c0_i32, %c0_i32_0 : i32, i32
  }
  func.func @transform_2(%arg0: i32) -> (i32, i32) {
    %c0_i32 = arith.constant 0 : i32
    %c0_i32_0 = arith.constant 0 : i32
    %c0_i32_1 = arith.constant 0 : i32
    return %c0_i32, %c0_i32_0 : i32, i32
  }
  func.func @transform_3(%arg0: i32) -> (i32, i32) {
    %c0_i32 = arith.constant 0 : i32
    %c0_i32_0 = arith.constant 0 : i32
    return %arg0, %c0_i32 : i32, i32
  }
  func.func @transform_4(%arg0: i32) -> (i32, i32, i32) {
    %c0_i32 = arith.constant 0 : i32
    %c0_i32_0 = arith.constant 0 : i32
    %c0_i32_1 = arith.constant 0 : i32
    return %arg0, %c0_i32, %c0_i32_0 : i32, i32, i32
  }
}

module attributes {stable_mosaic.version = 11 : i64} {
  func.func @_bn_relu_kernel(%arg0: i32, %arg1: memref<64x128xbf16, #tpu.memory_space<vmem>>, %arg2: memref<1x128xf32, #tpu.memory_space<vmem>>, %arg3: memref<1x128xf32, #tpu.memory_space<vmem>>, %arg4: memref<64x128xf32, #tpu.memory_space<vmem>>) attributes {dimension_semantics = [#tpu.dimension_semantics<parallel>], iteration_bounds = array<i64: 1>, scalar_prefetch = 0 : i64, scratch_operands = 0 : i64, tpu.core_type = #tpu.core_type<tc>, window_params = [{transform_indices = @transform_0, window_bounds = array<i64: 64, 128>}, {pipeline_mode = #tpu.pipeline_mode<synchronous>, transform_indices = @transform_1, window_bounds = array<i64: 1, 128>}, {pipeline_mode = #tpu.pipeline_mode<synchronous>, transform_indices = @transform_2, window_bounds = array<i64: 1, 128>}, {transform_indices = @transform_3, window_bounds = array<i64: 64, 128>}]} {
    %c0 = arith.constant 0 : index
    %c0_0 = arith.constant 0 : index
    %0 = vector.load %arg1[%c0, %c0_0] : memref<64x128xbf16, #tpu.memory_space<vmem>>, vector<64x128xbf16>
    %1 = arith.extf %0 : vector<64x128xbf16> to vector<64x128xf32>
    %c0_1 = arith.constant 0 : index
    %c0_2 = arith.constant 0 : index
    %2 = vector.load %arg2[%c0_1, %c0_2] : memref<1x128xf32, #tpu.memory_space<vmem>>, vector<1x128xf32>
    %3 = vector.broadcast %2 : vector<1x128xf32> to vector<64x128xf32>
    %4 = arith.mulf %1, %3 : vector<64x128xf32>
    %c0_3 = arith.constant 0 : index
    %c0_4 = arith.constant 0 : index
    %5 = vector.load %arg3[%c0_3, %c0_4] : memref<1x128xf32, #tpu.memory_space<vmem>>, vector<1x128xf32>
    %6 = vector.broadcast %5 : vector<1x128xf32> to vector<64x128xf32>
    %7 = arith.addf %4, %6 : vector<64x128xf32>
    %cst = arith.constant 0.000000e+00 : f32
    %8 = vector.broadcast %cst : f32 to vector<64x128xf32>
    %9 = arith.maximumf %7, %8 : vector<64x128xf32>
    %c0_5 = arith.constant 0 : index
    %c0_6 = arith.constant 0 : index
    %10 = vector.load %arg4[%c0_5, %c0_6] : memref<64x128xf32, #tpu.memory_space<vmem>>, vector<64x128xf32>
    tpu.vector_store %arg4[%c0_5, %c0_6], %9 {strides = array<i32>} : memref<64x128xf32, #tpu.memory_space<vmem>>, vector<64x128xf32>,
    return
  }
  func.func @transform_0(%arg0: i32) -> (i32, i32) {
    %c0_i32 = arith.constant 0 : i32
    %c0_i32_0 = arith.constant 0 : i32
    return %arg0, %c0_i32 : i32, i32
  }
  func.func @transform_1(%arg0: i32) -> (i32, i32) {
    %c0_i32 = arith.constant 0 : i32
    %c0_i32_0 = arith.constant 0 : i32
    %c0_i32_1 = arith.constant 0 : i32
    return %c0_i32, %c0_i32_0 : i32, i32
  }
  func.func @transform_2(%arg0: i32) -> (i32, i32) {
    %c0_i32 = arith.constant 0 : i32
    %c0_i32_0 = arith.constant 0 : i32
    %c0_i32_1 = arith.constant 0 : i32
    return %c0_i32, %c0_i32_0 : i32, i32
  }
  func.func @transform_3(%arg0: i32) -> (i32, i32) {
    %c0_i32 = arith.constant 0 : i32
    %c0_i32_0 = arith.constant 0 : i32
    return %arg0, %c0_i32 : i32, i32
  }
}

</mosaic_0001>

<bundles_post_ra>
// kernel: tile.13
= control target key start
LH: loop header
LB: loop body
LE: loop exit
PB: predicated region body
PF: predicated region fallthrough
CT: control target
= control target key end

     0   :  { %s22_s0 = inlined_call_operand.vmem [shape: f32[16], index: 0, kind: input, shape index: {}]   ;;  %s23_s1 = inlined_call_operand.vmem [shape: f32[8,16], index: 1, kind: output, shape index: {}]  }
   0x1   :  { %v4_v0 = vld [vmem:[%s22_s0] ss:$0 sm:$0xff] }
   0x2   :  { %5 = vst [vmem:[%s23_s1] sm:$0xff] %v4_v0 }

// kernel: tile.14
= control target key start
LH: loop header
LB: loop body
LE: loop exit
PB: predicated region body
PF: predicated region fallthrough
CT: control target
= control target key end

     0   :  { %s67_s10 = smov 112   ;;  %s68_s11 = smov 80   ;;  %vm3_vm0 = vcmask 130048   ;;  %vm9_vm1 = vcmask 1048448   ;;  %vm15_vm2 = vcmask 917248   ;;  %vm21_vm3 = vcmask 786048   ;;  %s111_s0 = inlined_call_operand.vmem [shape: f32[8,16], index: 0, kind: input, shape index: {}]   ;;  %s112_s1 = inlined_call_operand.vmem [shape: f32[1,128], index: 1, kind: output, shape index: {}]  }
   0x1   :  { %v53_v0 = vld [vmem:[%s111_s0 + $0x7] sm:$0x1]   ;;  %v55_v1 = vld [vmem:[%s111_s0 + $0x5] sm:$0x1]   ;;  %v54_v2 = vld [vmem:[%s111_s0 + $0x6] sm:$0x1]  }
   0x2   :  { %7 = vrot.lane.b32.xlu0 %v53_v0, %s67_s10  ;;  %19 = vrot.lane.b32.xlu1 %v55_v1, %s68_s11  ;;  %v56_v3 = vld [vmem:[%s111_s0 + $0x4] sm:$0x1]   ;;  %v2_v4 = vld [vmem:[%s111_s0] sm:$0x1]   ;;  %s69_s18 = smov 96   ;;  %s70_s19 = smov 64  }
   0x3   :  { %4 = vst.msk [vmem:[#allocation0] sm:$0x1] %vm3_vm0, %v2_v4   ;;  %v57_v5 = vld [vmem:[%s111_s0 + $0x3] sm:$0x1]   ;;  %v58_v6 = vld [vmem:[%s111_s0 + $0x2] sm:$0x1]  }
   0x4   :  { %s71_s24 = smov 48   ;;  %s72_s25 = smov 32   ;;  %v59_v7 = vld [vmem:[%s111_s0 + $0x1] sm:$0x1]   ;;  %vm27_vm4 = vcmask 654848   ;;  %vm33_vm5 = vcmask 523648  }
   0x5   :  { %s73_s0 = smov 16   ;;  %vm39_vm6 = vcmask 392448   ;;  %vm45_vm7 = vcmask 261248  }
   0x6   :  { %13 = vrot.lane.b32.xlu0 %v54_v2, %s69_s18  ;;  %25 = vrot.lane.b32.xlu1 %v56_v3, %s70_s19 }
   0xa   :  { %31 = vrot.lane.b32.xlu0 %v57_v5, %s71_s24  ;;  %37 = vrot.lane.b32.xlu1 %v58_v6, %s72_s25 }
   0xe   :  { %43 = vrot.lane.b32.xlu0 %v59_v7, %s73_s0 }
  0x74   :  { %v8_v8 = vpop.permute.xlu0 %7   ;;  %v20_v9 = vpop.permute.xlu1 %19  }
  0x75   :  { %10 = vst.msk [vmem:[#allocation0] sm:$0x1] %vm9_vm1, %v8_v8  }
  0x78   :  { %v14_v10 = vpop.permute.xlu0 %13   ;;  %v26_v11 = vpop.permute.xlu1 %25  }
  0x79   :  { %16 = vst.msk [vmem:[#allocation0] sm:$0x1] %vm15_vm2, %v14_v10  }
  0x7a   :  { %22 = vst.msk [vmem:[#allocation0] sm:$0x1] %vm21_vm3, %v20_v9  }
  0x7b   :  { %28 = vst.msk [vmem:[#allocation0] sm:$0x1] %vm27_vm4, %v26_v11  }
  0x7c   :  { %v32_v12 = vpop.permute.xlu0 %31   ;;  %v38_v13 = vpop.permute.xlu1 %37  }
  0x7d   :  { %34 = vst.msk [vmem:[#allocation0] sm:$0x1] %vm33_vm5, %v32_v12  }
  0x7e   :  { %40 = vst.msk [vmem:[#allocation0] sm:$0x1] %vm39_vm6, %v38_v13  }
  0x80   :  { %v44_v14 = vpop.permute.xlu0 %43  }
  0x81   :  { %46 = vst.msk [vmem:[#allocation0] sm:$0x1] %vm45_vm7, %v44_v14  }
  0x88   :  { %v50_v15 = vld [vmem:[#allocation0] sm:$0x1] }
  0x89   :  { %52 = vst [vmem:[%s112_s1] sm:$0x1] %v50_v15 }

// kernel: pyconv2d_forward.2
= control target key start
LH: loop header
LB: loop body
LE: loop exit
PB: predicated region body
PF: predicated region fallthrough
CT: control target
= control target key end

     0   :  { %s1647_s15 = smov 0   ;;  %s1915_s0 = inlined_call_operand.vmem [shape: bf16[512,392], index: 0, kind: input, shape index: {}]   ;;  %s1916_s1 = inlined_call_operand.vmem [shape: bf16[392,32], index: 1, kind: input, shape index: {}]   ;;  %s1917_s2 = inlined_call_operand.vmem [shape: bf16[32,16], index: 2, kind: input, shape index: {}]   ;;  %s1918_s3 = inlined_call_operand.vmem [shape: bf16[64,128], index: 3, kind: output, shape index: {0}]   ;;  %s1919_s4 = inlined_call_operand.vmem [shape: f32[4,2,16], index: 4, kind: output, shape index: {1}]  }
   0x1 LB: > { %s1653_s16 = sadd.s32 4294967295, %s1612_s15   ;;  %p1300_p0 = scmp.ge.s32.totalorder %s1612_s15, 1  ;;  %s1612_s15 = sphi %s1647_s15, %s15_s15  }
   0x2   : > { %p167_p1 = scmp.lt.s32.totalorder %s1612_s15, 5 }
   0x4   : > { %p168_p2 = pnand %p1300_p0, %p167_p1 }
   0x5   : > { %v1531_v0 = vld [vmem:[%s1916_s1 + $0x40] sm:$0xff] (!%p168_p2)   ;;  %v1614_v1 = vmov (!%p168_p2), 0   ;;  %v1534_v4 = vld [vmem:[%s1916_s1 + $0x48] sm:$0xff] (!%p168_p2)   ;;  %v1537_v7 = vld [vmem:[%s1916_s1 + $0x50] sm:$0xff] (!%p168_p2)   ;;  %s1301_s9 = sshll.u32 (!%p168_p2), %s1653_s16, 4  ;;  %vm596_vm0 = vcmask (!%p168_p2), 64512  }
   0x6   : > { %171 = sbr.rel (%p168_p2) target bundleno = 655 (0x28f), region = 32  ;;  %722 = vmatprep.subr.bf16.mxu1 (!%p168_p2), %v1614_v1  ;;  %v1532_v2 = vld [vmem:[%s1916_s1 + $0x80] sm:$0xff] (!%p168_p2)   ;;  %1417 = vmatprep.subr.bf16.mxu0 (!%p168_p2), %v1531_v0  ;;  %v1535_v5 = vld [vmem:[%s1916_s1 + $0x88] sm:$0xff] (!%p168_p2)   ;;  %v1538_v8 = vld [vmem:[%s1916_s1 + $0x90] sm:$0xff] (!%p168_p2)   ;;  %p199_p3 = scmp.lt.s32.totalorder (!%p168_p2), %s1301_s9, 63  ;;  %vm621_vm1 = vcmask (!%p168_p2), 1043456  }
   0x7   : > { %v1533_v3 = vld [vmem:[%s1916_s1] sm:$0xff] (!%p168_p2)   ;;  %723 = vmatpush1.bf16.msra.mxu1 (!%p168_p2), %v1532_v2  ;;  %v1536_v6 = vld [vmem:[%s1916_s1 + $0x8] sm:$0xff] (!%p168_p2)   ;;  %v1539_v9 = vld [vmem:[%s1916_s1 + $0x10] sm:$0xff] (!%p168_p2)   ;;  %vm859_vm2 = vcmask (!%p168_p2), 261120   ;;  %vm1097_vm3 = vcmask (!%p168_p2), 130048   ;;  %vm996_vm4 = vcmask (!%p168_p2), 125952  }
   0x8   : > { %1418 = vmatpush3.bf16.msra.mxu0 (!%p168_p2), %v1533_v3  ;;  %724 = vmatprep.subr.bf16.mxu1 (!%p168_p2), %v1614_v1  ;;  %v1540_v10 = vld [vmem:[%s1916_s1 + $0x58] sm:$0xff] (!%p168_p2)   ;;  %v1543_v13 = vld [vmem:[%s1916_s1 + $0x60] sm:$0xff] (!%p168_p2)   ;;  %v1546_v16 = vld [vmem:[%s1916_s1 + $0x68] sm:$0xff] (!%p168_p2)   ;;  %s1615_s7 = smov (!%p168_p2), 16   ;;  %s1616_s8 = smov (!%p168_p2), 48   ;;  %vm1010_vm5 = vcmask (!%p168_p2), 257152  }
   0x9   : > { %1419 = vmatprep.subr.bf16.mxu0 (!%p168_p2), %v1534_v4  ;;  %v1541_v11 = vld [vmem:[%s1916_s1 + $0x98] sm:$0xff] (!%p168_p2)   ;;  %v1544_v14 = vld [vmem:[%s1916_s1 + $0xa0] sm:$0xff] (!%p168_p2)   ;;  %v1547_v17 = vld [vmem:[%s1916_s1 + $0xa8] sm:$0xff] (!%p168_p2)   ;;  %s1619_s11 = smov (!%p168_p2), 64   ;;  %s1620_s12 = smov (!%p168_p2), 96   ;;  %vm1205_vm6 = vcmask (!%p168_p2), 1040384  }
   0xa   : > { %v1542_v12 = vld [vmem:[%s1916_s1 + $0x18] sm:$0xff] (!%p168_p2)   ;;  %v1545_v15 = vld [vmem:[%s1916_s1 + $0x20] sm:$0xff] (!%p168_p2)   ;;  %v1548_v18 = vld [vmem:[%s1916_s1 + $0x28] sm:$0xff] (!%p168_p2)   ;;  %s1621_s13 = smov (!%p168_p2), 112   ;;  %p211_p5 = scmp.lt.s32.totalorder (!%p168_p2), %s1653_s16, 3  ;;  %vm1207_vm7 = vcmask (!%p168_p2), 123904  }
   0xb   : > { %725 = vmatpush1.bf16.msra.mxu1 (!%p168_p2), %v1535_v5  ;;  %v1549_v19 = vld [vmem:[%s1916_s1 + $0x70] sm:$0xff] (!%p168_p2)   ;;  %v1552_v22 = vld [vmem:[%s1916_s1 + $0x78] sm:$0xff] (!%p168_p2)   ;;  %v1558_v27 = vld [vmem:[%s1916_s1 + $0xc0] ss:$0 sps:$4 sm:$0xff] (!%p168_p2)   ;;  %vm1024_vm8 = vcmask (!%p168_p2), 388352   ;;  %vm1038_vm9 = vcmask (!%p168_p2), 519552  }
   0xc   : > { %1420 = vmatpush3.bf16.msra.mxu0 (!%p168_p2), %v1536_v6  ;;  %726 = vmatprep.subr.bf16.mxu1 (!%p168_p2), %v1614_v1  ;;  %v1550_v20 = vld [vmem:[%s1916_s1 + $0xb0] sm:$0xff] (!%p168_p2)   ;;  %v1553_v24 = vld [vmem:[%s1916_s1 + $0xb8] sm:$0xff] (!%p168_p2)   ;;  %v623_v29 = vsel (!%p168_p2), %vm621_vm1, %v1558_v27, 0  ;;  %v1604_v37 = vld [vmem:[%s1917_s2] sm:$0xff] (!%p168_p2)   ;;  %vm1052_vm10 = vcmask (!%p168_p2), 650752   ;;  %vm1066_vm11 = vcmask (!%p168_p2), 781952  }
   0xd   : > { %1421 = vmatprep.subr.bf16.mxu0 %v1537_v7  ;;  %s1921_s9 = smov (!%p199_p3, %s1301_s9), 63  ;;  %v1551_v21 = vld [vmem:[%s1916_s1 + $0x30] sm:$0xff]   ;;  %v1554_v26 = vld [vmem:[%s1916_s1 + $0x38] sm:$0xff]   ;;  %v1605_v60 = vld [vmem:[%s1917_s2 + $0x8] sm:$0xff]   ;;  %vm1080_vm12 = vcmask 913152   ;;  %vm1094_vm13 = vcmask 1044352  }
   0xe   : > { %s1400_s28 = sshll.u32 %s1921_s9, 4  ;;  %s1618_s9 = smov 80  }
   0xf   : > { %727 = vmatpush1.bf16.msra.mxu1 %v1538_v8  ;;  %s1724_s10 = scalar_lea.vmem %s1915_s0, %s1400_s28  ;;  %s1304_s28 = sshll.u32 %s1653_s16, 1 }
  0x10   : > { %1422 = vmatpush3.bf16.msra.mxu0 %v1539_v9  ;;  %728 = vmatprep.subr.bf16.mxu1 %v1614_v1  ;;  %v1557_v23 = vld [vmem:[%s1724_s10 + $0x4] ss:$16 sps:$4 sm:$0xff]   ;;  %v1561_v25 = vld [vmem:[%s1724_s10 + $0xc] ss:$16 sps:$4 sm:$0xff]   ;;  %v1555_v28 = vld [vmem:[%s1724_s10] ss:$16 sps:$4 sm:$0xff]  }
  0x11   : > { %1423 = vmatprep.subr.bf16.mxu0 %v1540_v10  ;;  %657 = vmatprep.mubr.bf16.mxu0 %v1557_v23  ;;  %v1562_v30 = vld [vmem:[%s1724_s10 + $0x24] ss:$16 sps:$4 sm:$0xff]   ;;  %v1559_v31 = vld [vmem:[%s1724_s10 + $0x8] ss:$16 sps:$4 sm:$0xff]   ;;  %v1565_v32 = vld [vmem:[%s1724_s10 + $0x2c] ss:$16 sps:$4 sm:$0xff]  }
  0x12   : > { %1364 = vmatprep.mubr.msk.bf16.mxu1 %vm596_vm0, %v1561_v25  ;;  %v1564_v33 = vld [vmem:[%s1724_s10 + $0x20] ss:$16 sps:$4 sm:$0xff]   ;;  %v1568_v34 = vld [vmem:[%s1724_s10 + $0x44] ss:$16 sps:$4 sm:$0xff]   ;;  %v1567_v35 = vld [vmem:[%s1724_s10 + $0x28] ss:$16 sps:$4 sm:$0xff]  }
  0x13   : > { %729 = vmatpush1.bf16.msra.mxu1 %v1541_v11  ;;  %v1571_v36 = vld [vmem:[%s1724_s10 + $0x4c] ss:$16 sps:$4 sm:$0xff]   ;;  %v1570_v38 = vld [vmem:[%s1724_s10 + $0x40] ss:$16 sps:$4 sm:$0xff]   ;;  %v1574_v39 = vld [vmem:[%s1724_s10 + $0x64] ss:$16 sps:$4 sm:$0xff]  }
  0x14   : > { %1424 = vmatpush3.bf16.msra.mxu0 %v1542_v12  ;;  %730 = vmatprep.subr.bf16.mxu1 %v1614_v1  ;;  %v1573_v40 = vld [vmem:[%s1724_s10 + $0x48] ss:$16 sps:$4 sm:$0xff]   ;;  %v1577_v41 = vld [vmem:[%s1724_s10 + $0x6c] ss:$16 sps:$4 sm:$0xff]   ;;  %v1576_v42 = vld [vmem:[%s1724_s10 + $0x60] ss:$16 sps:$4 sm:$0xff]  }
  0x15   : > { %1425 = vmatprep.subr.bf16.mxu0 %v1543_v13  ;;  %v1580_v43 = vld [vmem:[%s1724_s10 + $0x84] ss:$16 sps:$4 sm:$0xff]   ;;  %v1579_v44 = vld [vmem:[%s1724_s10 + $0x68] ss:$16 sps:$4 sm:$0xff]   ;;  %v1583_v45 = vld [vmem:[%s1724_s10 + $0x8c] ss:$16 sps:$4 sm:$0xff]  }
  0x16   : > { %v1582_v46 = vld [vmem:[%s1724_s10 + $0x80] ss:$16 sps:$4 sm:$0xff]   ;;  %v1586_v47 = vld [vmem:[%s1724_s10 + $0xa4] ss:$16 sps:$4 sm:$0xff]   ;;  %v1585_v48 = vld [vmem:[%s1724_s10 + $0x88] ss:$16 sps:$4 sm:$0xff]  }
  0x17   : > { %731 = vmatpush1.bf16.msra.mxu1 %v1544_v14  ;;  %v1589_v49 = vld [vmem:[%s1724_s10 + $0xac] ss:$16 sps:$4 sm:$0xff]   ;;  %v1588_v50 = vld [vmem:[%s1724_s10 + $0xa0] ss:$16 sps:$4 sm:$0xff]   ;;  %v1592_v51 = vld [vmem:[%s1724_s10 + $0xc4] ss:$16 sps:$4 sm:$0xff]  }
  0x18   : > { %1426 = vmatpush3.bf16.msra.mxu0 %v1545_v15  ;;  %732 = vmatprep.subr.bf16.mxu1 %v1614_v1  ;;  %v1591_v52 = vld [vmem:[%s1724_s10 + $0xa8] ss:$16 sps:$4 sm:$0xff]   ;;  %v1595_v53 = vld [vmem:[%s1724_s10 + $0xcc] ss:$16 sps:$4 sm:$0xff]   ;;  %v1594_v54 = vld [vmem:[%s1724_s10 + $0xc0] ss:$16 sps:$4 sm:$0xff]  }
  0x19   : > { %1427 = vmatprep.subr.bf16.mxu0 %v1546_v16  ;;  %v1598_v55 = vld [vmem:[%s1724_s10 + $0xe4] ss:$16 sps:$4 sm:$0xff]   ;;  %v1597_v56 = vld [vmem:[%s1724_s10 + $0xc8] ss:$16 sps:$4 sm:$0xff]   ;;  %v1601_v57 = vld [vmem:[%s1724_s10 + $0xec] ss:$16 sps:$4 sm:$0xff]  }
  0x1a   : > { %v1600_v58 = vld [vmem:[%s1724_s10 + $0xe0] ss:$16 sps:$4 sm:$0xff]   ;;  %v1603_v59 = vld [vmem:[%s1724_s10 + $0xe8] ss:$16 sps:$4 sm:$0xff]   ;;  %p206_p4 = scmp.lt.s32.totalorder %s1304_s28, 7  ;;  %s1617_s10 = smov 32  }
  0x1b   : > { %733 = vmatpush1.bf16.msra.mxu1 %v1547_v17  ;;  %s1925_s16 = smov (!%p211_p5, %s1653_s16), 3 }
  0x1c   : > { %1428 = vmatpush3.bf16.msra.mxu0 %v1548_v18  ;;  %734 = vmatprep.subr.bf16.mxu1 %v1614_v1  ;;  %s1923_s28 = smov (!%p206_p4, %s1304_s28), 7  ;;  %s1306_s14 = sshll.u32 %s1925_s16, 1 }
  0x1d   : > { %1429 = vmatprep.subr.bf16.mxu0 %v1549_v19  ;;  %s1305_s29 = sshll.u32 %s1923_s28, 2  ;;  %s214_s19 = scalar_lea.vmem %s1919_s4, %s1306_s14 }
  0x1e   : > { %s1807_s6 = scalar_lea.vmem %s1918_s3, %s1305_s29 }
  0x1f   : > { %735 = vmatpush1.bf16.msra.mxu1 %v1550_v20 }
  0x20   : > { %1430 = vmatpush3.bf16.msra.mxu0 %v1551_v21  ;;  %736 = vmatprep.subr.bf16.mxu1 %v1614_v1 }
  0x21   : > { %1431 = vmatprep.subr.bf16.mxu0 %v1552_v22 }
  0x23   : > { %737 = vmatpush1.bf16.msra.mxu1 %v1553_v24 }
  0x24   : > { %1432 = vmatpush3.bf16.msra.mxu0 %v1554_v26  ;;  %738 = vmatprep.subr.bf16.mxu1 %v1614_v1 }
  0x25   : > { %1491 = vmatprep.subr.bf16.mxu0 %v1604_v37 }
  0x27   : > { %658 = vmatmul.mubr.bf16.vlgmr.msra.gmra.mrb[0].mxu0 %v1555_v28  ;;  %739 = vmatpush1.bf16.msra.mxu1 %v623_v29 }
  0x28   : > { %665 = vmatprep.mubr.bf16.mxu0 %v1562_v30  ;;  %1511 = vmatprep.subr.bf16.mxu1 %v1604_v37 }
  0x29   : > { %1492 = vmatpush3.bf16.msra.mxu0 %v1604_v37 }
  0x2a   : > { %755 = vmatmul.mubr.bf16.vlgmr.msra.gmra.mrb[0].mxu1 %v1559_v31  ;;  %1493 = vmatprep.subr.bf16.mxu0 %v1605_v60 }
  0x2b   : > { %1365 = vmatprep.mubr.msk.bf16.mxu1 %vm596_vm0, %v1565_v32  ;;  %1513 = vmatpush3.bf16.msra.mxu1 %v1604_v37 }
  0x2c   : > { %1512 = vmatprep.subr.bf16.mxu1 %v1605_v60 }
  0x2d   : > { %1494 = vmatpush3.bf16.msra.mxu0 %v1605_v60 }
  0x2f   : > { %666 = vmatmul.mubr.bf16.gmra.mrb[4].mxu0 %v1564_v33  ;;  %1514 = vmatpush3.bf16.msra.mxu1 %v1605_v60 }
  0x30   : > { %673 = vmatprep.mubr.bf16.mxu0 %v1568_v34 }
  0x32   : > { %763 = vmatmul.mubr.bf16.gmra.mrb[4].mxu1 %v1567_v35 }
  0x33   : > { %1366 = vmatprep.mubr.msk.bf16.mxu1 %vm596_vm0, %v1571_v36 }
  0x37   : > { %674 = vmatmul.mubr.bf16.gmra.mrb[8].mxu0 %v1570_v38 }
  0x38   : > { %681 = vmatprep.mubr.bf16.mxu0 %v1574_v39 }
  0x3a   : > { %771 = vmatmul.mubr.bf16.gmra.mrb[8].mxu1 %v1573_v40 }
  0x3b   : > { %1367 = vmatprep.mubr.msk.bf16.mxu1 %vm596_vm0, %v1577_v41 }
  0x3f   : > { %682 = vmatmul.mubr.bf16.gmra.mrb[12].mxu0 %v1576_v42 }
  0x40   : > { %689 = vmatprep.mubr.bf16.mxu0 %v1580_v43 }
  0x42   : > { %779 = vmatmul.mubr.bf16.gmra.mrb[12].mxu1 %v1579_v44 }
  0x43   : > { %1368 = vmatprep.mubr.msk.bf16.mxu1 %vm596_vm0, %v1583_v45 }
  0x47   : > { %690 = vmatmul.mubr.bf16.gmra.mrb[16].mxu0 %v1582_v46 }
  0x48   : > { %697 = vmatprep.mubr.bf16.mxu0 %v1586_v47 }
  0x4a   : > { %787 = vmatmul.mubr.bf16.gmra.mrb[16].mxu1 %v1585_v48 }
  0x4b   : > { %1369 = vmatprep.mubr.msk.bf16.mxu1 %vm596_vm0, %v1589_v49 }
  0x4f   : > { %698 = vmatmul.mubr.bf16.gmra.mrb[20].mxu0 %v1588_v50 }
  0x50   : > { %705 = vmatprep.mubr.bf16.mxu0 %v1592_v51 }
  0x52   : > { %795 = vmatmul.mubr.bf16.gmra.mrb[20].mxu1 %v1591_v52 }
  0x53   : > { %1370 = vmatprep.mubr.msk.bf16.mxu1 %vm596_vm0, %v1595_v53 }
  0x57   : > { %706 = vmatmul.mubr.bf16.gmra.mrb[24].mxu0 %v1594_v54 }
  0x58   : > { %713 = vmatprep.mubr.bf16.mxu0 %v1598_v55 }
  0x5a   : > { %803 = vmatmul.mubr.bf16.gmra.mrb[24].mxu1 %v1597_v56 }
  0x5b   : > { %1371 = vmatprep.mubr.msk.bf16.mxu1 %vm596_vm0, %v1601_v57 }
  0x5f   : > { %714 = vmatmul.mubr.bf16.gmra.mrb[28].mxu0 %v1600_v58 }
  0x62   : > { %811 = vmatmul.mubr.bf16.gmra.mrb[28].mxu1 %v1603_v59 }
  0xfa   : > { %v1433_v61 = vpop.f32.mrb[0].mxu0 }
  0xfb   : > { %v1434_v62 = vpop.f32.mrb[1].mxu0 }
  0xfc   : > { %v1435_v63 = vadd.f32 %v1434_v62, %v1433_v61  ;;  %v1436_v0 = vpop.f32.mrb[2].mxu0 }
  0xfd   : > { %v1437_v1 = vpop.f32.mrb[3].mxu0  ;;  %v756_v2 = vpop.f32.mrb[0].mxu1 }
  0xfe   : > { %v1438_v3 = vadd.f32 %v1437_v1, %v1436_v0  ;;  %v757_v4 = vadd.f32 %v1435_v63, %v756_v2  ;;  %v758_v5 = vpop.f32.mrb[1].mxu1 }
  0xff   : > { %v759_v6 = vpop.f32.mrb[2].mxu1 }
 0x100   : > { %v760_v7 = vadd.f32 %v1438_v3, %v759_v6  ;;  %v761_v8 = vpop.f32.mrb[3].mxu1  ;;  %v819_v9 = vmax.f32 %v757_v4, 0.0 }
 0x102   : > { %v820_v10 = vmax.f32 %v760_v7, 0.0  ;;  %v1439_v11 = vpop.f32.mrb[4].mxu0 }
 0x103   : > { %v1440_v12 = vpop.f32.mrb[5].mxu0 }
 0x104   : > { %v835_v13 = vpack.c.bf16 %v820_v10, %v819_v9  ;;  %v1441_v14 = vadd.f32 %v1440_v12, %v1439_v11  ;;  %v1442_v15 = vpop.f32.mrb[6].mxu0 }
 0x105   : > { %v1443_v16 = vpop.f32.mrb[7].mxu0  ;;  %v764_v17 = vpop.f32.mrb[4].mxu1 }
 0x106   : > { %v1444_v18 = vadd.f32 %v1443_v16, %v1442_v15  ;;  %v765_v19 = vadd.f32 %v1441_v14, %v764_v17  ;;  %v766_v20 = vpop.f32.mrb[5].mxu1  ;;  %1495 = vmatprep.mubr.msk.bf16.mxu0 %vm859_vm2, %v835_v13 }
 0x107   : > { %v767_v21 = vpop.f32.mrb[6].mxu1 }
 0x108   : > { %v768_v22 = vadd.f32 %v1444_v18, %v767_v21  ;;  %v769_v23 = vpop.f32.mrb[7].mxu1  ;;  %v821_v24 = vmax.f32 %v765_v19, 0.0 }
 0x10a   : > { %v822_v25 = vmax.f32 %v768_v22, 0.0  ;;  %v1445_v26 = vpop.f32.mrb[8].mxu0 }
 0x10b   : > { %v1446_v27 = vpop.f32.mrb[9].mxu0 }
 0x10c   : > { %v836_v28 = vpack.c.bf16 %v822_v25, %v821_v24  ;;  %v1447_v29 = vadd.f32 %v1446_v27, %v1445_v26  ;;  %v1448_v30 = vpop.f32.mrb[10].mxu0 }
 0x10d   : > { %v1449_v31 = vpop.f32.mrb[11].mxu0  ;;  %v772_v32 = vpop.f32.mrb[8].mxu1 }
 0x10e   : > { %v1450_v33 = vadd.f32 %v1449_v31, %v1448_v30  ;;  %v773_v34 = vadd.f32 %v1447_v29, %v772_v32  ;;  %v774_v35 = vpop.f32.mrb[9].mxu1  ;;  %1496 = vmatmul.mubr.msk.bf16.vlgmr.msra.gmra.mrb[32].mxu0 %vm859_vm2, %v836_v28 }
 0x10f   : > { %v775_v36 = vpop.f32.mrb[10].mxu1 }
 0x110   : > { %v776_v37 = vadd.f32 %v1450_v33, %v775_v36  ;;  %v777_v38 = vpop.f32.mrb[11].mxu1  ;;  %v823_v39 = vmax.f32 %v773_v34, 0.0 }
 0x112   : > { %v824_v40 = vmax.f32 %v776_v37, 0.0  ;;  %v1451_v41 = vpop.f32.mrb[12].mxu0 }
 0x113   : > { %v1452_v42 = vpop.f32.mrb[13].mxu0 }
 0x114   : > { %v837_v43 = vpack.c.bf16 %v824_v40, %v823_v39  ;;  %v1453_v44 = vadd.f32 %v1452_v42, %v1451_v41  ;;  %v1454_v45 = vpop.f32.mrb[14].mxu0 }
 0x115   : > { %v1455_v46 = vpop.f32.mrb[15].mxu0  ;;  %v780_v47 = vpop.f32.mrb[12].mxu1 }
 0x116   : > { %v1456_v48 = vadd.f32 %v1455_v46, %v1454_v45  ;;  %v781_v49 = vadd.f32 %v1453_v44, %v780_v47  ;;  %v782_v50 = vpop.f32.mrb[13].mxu1  ;;  %1499 = vmatprep.mubr.msk.bf16.mxu0 %vm859_vm2, %v837_v43 }
 0x117   : > { %v783_v51 = vpop.f32.mrb[14].mxu1 }
 0x118   : > { %v784_v52 = vadd.f32 %v1456_v48, %v783_v51  ;;  %v785_v53 = vpop.f32.mrb[15].mxu1  ;;  %v825_v54 = vmax.f32 %v781_v49, 0.0 }
 0x11a   : > { %v826_v55 = vmax.f32 %v784_v52, 0.0  ;;  %v1457_v56 = vpop.f32.mrb[16].mxu0 }
 0x11b   : > { %v1458_v57 = vpop.f32.mrb[17].mxu0 }
 0x11c   : > { %v838_v58 = vpack.c.bf16 %v826_v55, %v825_v54  ;;  %v1459_v59 = vadd.f32 %v1458_v57, %v1457_v56  ;;  %v1460_v60 = vpop.f32.mrb[18].mxu0 }
 0x11d   : > { %v1461_v61 = vpop.f32.mrb[19].mxu0  ;;  %v788_v62 = vpop.f32.mrb[16].mxu1 }
 0x11e   : > { %v1462_v63 = vadd.f32 %v1461_v61, %v1460_v60  ;;  %v789_v0 = vadd.f32 %v1459_v59, %v788_v62  ;;  %v790_v1 = vpop.f32.mrb[17].mxu1  ;;  %1500 = vmatmul.mubr.msk.bf16.gmra.mrb[36].mxu0 %vm859_vm2, %v838_v58 }
 0x11f   : > { %v791_v2 = vpop.f32.mrb[18].mxu1 }
 0x120   : > { %v792_v3 = vadd.f32 %v1462_v63, %v791_v2  ;;  %v793_v4 = vpop.f32.mrb[19].mxu1  ;;  %v827_v5 = vmax.f32 %v789_v0, 0.0 }
 0x122   : > { %v828_v6 = vmax.f32 %v792_v3, 0.0  ;;  %v1463_v7 = vpop.f32.mrb[20].mxu0 }
 0x123   : > { %v1464_v8 = vpop.f32.mrb[21].mxu0 }
 0x124   : > { %v839_v9 = vpack.c.bf16 %v828_v6, %v827_v5  ;;  %v1465_v10 = vadd.f32 %v1464_v8, %v1463_v7  ;;  %v1466_v11 = vpop.f32.mrb[22].mxu0 }
 0x125   : > { %v1467_v12 = vpop.f32.mrb[23].mxu0  ;;  %v796_v13 = vpop.f32.mrb[20].mxu1 }
 0x126   : > { %v1468_v14 = vadd.f32 %v1467_v12, %v1466_v11  ;;  %v797_v15 = vadd.f32 %v1465_v10, %v796_v13  ;;  %v798_v16 = vpop.f32.mrb[21].mxu1  ;;  %1503 = vmatprep.mubr.msk.bf16.mxu0 %vm859_vm2, %v839_v9 }
 0x127   : > { %v799_v17 = vpop.f32.mrb[22].mxu1 }
 0x128   : > { %v800_v18 = vadd.f32 %v1468_v14, %v799_v17  ;;  %v801_v19 = vpop.f32.mrb[23].mxu1  ;;  %v829_v20 = vmax.f32 %v797_v15, 0.0 }
 0x12a   : > { %v830_v21 = vmax.f32 %v800_v18, 0.0  ;;  %v1469_v22 = vpop.f32.mrb[24].mxu0 }
 0x12b   : > { %v1470_v23 = vpop.f32.mrb[25].mxu0 }
 0x12c   : > { %v840_v24 = vpack.c.bf16 %v830_v21, %v829_v20  ;;  %v1471_v25 = vadd.f32 %v1470_v23, %v1469_v22  ;;  %v1472_v26 = vpop.f32.mrb[26].mxu0 }
 0x12d   : > { %v1473_v27 = vpop.f32.mrb[27].mxu0  ;;  %v804_v28 = vpop.f32.mrb[24].mxu1 }
 0x12e   : > { %v1474_v29 = vadd.f32 %v1473_v27, %v1472_v26  ;;  %v805_v30 = vadd.f32 %v1471_v25, %v804_v28  ;;  %v806_v31 = vpop.f32.mrb[25].mxu1  ;;  %1504 = vmatmul.mubr.msk.bf16.gmra.mrb[40].mxu0 %vm859_vm2, %v840_v24 }
 0x12f   : > { %v807_v32 = vpop.f32.mrb[26].mxu1 }
 0x130   : > { %v808_v33 = vadd.f32 %v1474_v29, %v807_v32  ;;  %v809_v34 = vpop.f32.mrb[27].mxu1  ;;  %v831_v35 = vmax.f32 %v805_v30, 0.0 }
 0x132   : > { %v832_v36 = vmax.f32 %v808_v33, 0.0  ;;  %v1475_v37 = vpop.f32.mrb[28].mxu0 }
 0x133   : > { %v1476_v38 = vpop.f32.mrb[29].mxu0 }
 0x134   : > { %v841_v39 = vpack.c.bf16 %v832_v36, %v831_v35  ;;  %v1477_v40 = vadd.f32 %v1476_v38, %v1475_v37  ;;  %v1478_v41 = vpop.f32.mrb[30].mxu0 }
 0x135   : > { %v1479_v42 = vpop.f32.mrb[31].mxu0  ;;  %v812_v43 = vpop.f32.mrb[28].mxu1 }
 0x136   : > { %v1480_v44 = vadd.f32 %v1479_v42, %v1478_v41  ;;  %v813_v45 = vadd.f32 %v1477_v40, %v812_v43  ;;  %v814_v46 = vpop.f32.mrb[29].mxu1  ;;  %1507 = vmatprep.mubr.msk.bf16.mxu1 %vm859_vm2, %v841_v39 }
 0x137   : > { %v815_v47 = vpop.f32.mrb[30].mxu1 }
 0x138   : > { %v816_v48 = vadd.f32 %v1480_v44, %v815_v47  ;;  %v817_v49 = vpop.f32.mrb[31].mxu1  ;;  %v833_v50 = vmax.f32 %v813_v45, 0.0 }
 0x13a   : > { %v834_v51 = vmax.f32 %v816_v48, 0.0 }
 0x13c   : > { %v842_v52 = vpack.c.bf16 %v834_v51, %v833_v50 }
 0x13e   : > { %1508 = vmatmul.mubr.msk.bf16.vlgmr.msra.gmra.mrb[32].mxu1 %vm859_vm2, %v842_v52 }
 0x1e1   : > { %v1802_v53 = vpop.f32.mrb[32].mxu0 }
 0x1e2   : > { %v1809_v54 = vpop.f32.mrb[33].mxu0  ;;  %v1403_v55 = vpack.c.bf16 %v1802_v53, %v1802_v53  ;;  %v1101_v0 = vsel %vm1097_vm3, %v1802_v53, 0.0 }
 0x1e3   : > { %v1401_v56 = vpack.c.bf16 %v1809_v54, %v1809_v54  ;;  %v1815_v57 = vpop.f32.mrb[34].mxu0  ;;  %v1098_v59 = vsel %vm1097_vm3, %v1809_v54, 0.0 }
 0x1e4   : > { %1004 = vrot.lane.b32.xlu0 %v1403_v55, %s1615_s7  ;;  %v1817_v58 = vpop.f32.mrb[35].mxu0  ;;  %v1404_v62 = vpack.c.bf16 %v1815_v57, %v1815_v57  ;;  %v1103_v2 = vsel %vm1097_vm3, %v1815_v57, 0.0 }
 0x1e5   : > { %997 = vst.msk [vmem:[%s1807_s6] sm:$0xf] %vm996_vm4, %v1401_v56  ;;  %v1402_v60 = vpack.c.bf16 %v1817_v58, %v1817_v58  ;;  %v1099_v61 = vsel %vm1097_vm3, %v1817_v58, 0.0 }
 0x1e6   : > { %v1100_v63 = vadd.f32 %v1099_v61, %v1098_v59 }
 0x1e7   : > { %998 = vst.msk [vmem:[%s1807_s6 + $0x4] sm:$0xf] %vm996_vm4, %v1402_v60 }
 0x1e8   : > { %v1102_v1 = vadd.f32 %v1101_v0, %v1100_v63  ;;  %1006 = vrot.lane.b32.xlu0 %v1404_v62, %s1615_s7 }
 0x1ea   : > { %v1104_v3 = vadd.f32 %v1103_v2, %v1102_v1 }
 0x1f1   : > { %v1833_v4 = vpop.f32.mrb[36].mxu0 }
 0x1f2   : > { %v1407_v5 = vpack.c.bf16 %v1833_v4, %v1833_v4  ;;  %v1837_v6 = vpop.f32.mrb[37].mxu0  ;;  %v1109_v14 = vsel %vm1097_vm3, %v1833_v4, 0.0 }
 0x1f3   : > { %v1105_v7 = vsel %vm1097_vm3, %v1837_v6, 0.0  ;;  %v1841_v8 = vpop.f32.mrb[38].mxu0  ;;  %v1405_v9 = vpack.c.bf16 %v1837_v6, %v1837_v6 }
 0x1f4   : > { %v1106_v10 = vadd.f32 %v1105_v7, %v1104_v3  ;;  %1032 = vrot.lane.b32.xlu0 %v1407_v5, %s1616_s8  ;;  %v1845_v11 = vpop.f32.mrb[39].mxu0  ;;  %v1408_v15 = vpack.c.bf16 %v1841_v8, %v1841_v8  ;;  %v1111_v17 = vsel %vm1097_vm3, %v1841_v8, 0.0 }
 0x1f5   : > { %v1107_v12 = vsel %vm1097_vm3, %v1845_v11, 0.0  ;;  %1018 = vrot.lane.b32.xlu1 %v1405_v9, %s1617_s10  ;;  %v1406_v19 = vpack.c.bf16 %v1845_v11, %v1845_v11 }
 0x1f6   : > { %v1108_v13 = vadd.f32 %v1107_v12, %v1106_v10 }
 0x1f8   : > { %v1110_v16 = vadd.f32 %v1109_v14, %v1108_v13 }
 0x1f9   : > { %1034 = vrot.lane.b32.xlu1 %v1408_v15, %s1616_s8 }
 0x1fa   : > { %v1112_v18 = vadd.f32 %v1111_v17, %v1110_v16 }
 0x1fd   : > { %1020 = vrot.lane.b32.xlu1 %v1406_v19, %s1617_s10 }
 0x201   : > { %v1505_v20 = vpop.f32.mrb[40].mxu0 }
 0x202   : > { %v1411_v21 = vpack.c.bf16 %v1505_v20, %v1505_v20  ;;  %v950_v22 = vpop.f32.mrb[41].mxu0  ;;  %v1117_v31 = vsel %vm1097_vm3, %v1505_v20, 0.0 }
 0x203   : > { %v1113_v23 = vsel %vm1097_vm3, %v950_v22, 0.0  ;;  %v1506_v24 = vpop.f32.mrb[42].mxu0  ;;  %v1409_v29 = vpack.c.bf16 %v950_v22, %v950_v22 }
 0x204   : > { %v1114_v25 = vadd.f32 %v1113_v23, %v1112_v18  ;;  %v1412_v26 = vpack.c.bf16 %v1506_v24, %v1506_v24  ;;  %1060 = vrot.lane.b32.xlu0 %v1411_v21, %s1618_s9  ;;  %v953_v27 = vpop.f32.mrb[43].mxu0  ;;  %v1119_v34 = vsel %vm1097_vm3, %v1506_v24, 0.0 }
 0x205   : > { %v1115_v28 = vsel %vm1097_vm3, %v953_v27, 0.0  ;;  %v1410_v32 = vpack.c.bf16 %v953_v27, %v953_v27 }
 0x206   : > { %v1116_v30 = vadd.f32 %v1115_v28, %v1114_v25  ;;  %1062 = vrot.lane.b32.xlu1 %v1412_v26, %s1618_s9 }
 0x208   : > { %v1118_v33 = vadd.f32 %v1117_v31, %v1116_v30  ;;  %1046 = vrot.lane.b32.xlu0 %v1409_v29, %s1619_s11 }
 0x20a   : > { %1048 = vrot.lane.b32.xlu1 %v1410_v32, %s1619_s11  ;;  %v1120_v35 = vadd.f32 %v1119_v34, %v1118_v33 }
 0x211   : > { %v1509_v36 = vpop.f32.mrb[32].mxu1 }
 0x212   : > { %v966_v37 = vpop.f32.mrb[33].mxu1  ;;  %v1415_v46 = vpack.c.bf16 %v1509_v36, %v1509_v36  ;;  %v1125_v47 = vsel %vm1097_vm3, %v1509_v36, 0.0 }
 0x213   : > { %v1413_v38 = vpack.c.bf16 %v966_v37, %v966_v37  ;;  %v1121_v39 = vsel %vm1097_vm3, %v966_v37, 0.0  ;;  %v1510_v40 = vpop.f32.mrb[34].mxu1 }
 0x214   : > { %v1122_v41 = vadd.f32 %v1121_v39, %v1120_v35  ;;  %v969_v42 = vpop.f32.mrb[35].mxu1  ;;  %v1416_v49 = vpack.c.bf16 %v1510_v40, %v1510_v40  ;;  %v1127_v50 = vsel %vm1097_vm3, %v1510_v40, 0.0 }
 0x215   : > { %v1414_v43 = vpack.c.bf16 %v969_v42, %v969_v42  ;;  %v1123_v44 = vsel %vm1097_vm3, %v969_v42, 0.0  ;;  %1074 = vrot.lane.b32.xlu0 %v1413_v38, %s1620_s12 }
 0x216   : > { %v1124_v45 = vadd.f32 %v1123_v44, %v1122_v41 }
 0x217   : > { %1076 = vrot.lane.b32.xlu1 %v1414_v43, %s1620_s12 }
 0x218   : > { %v1126_v48 = vadd.f32 %v1125_v47, %v1124_v45 }
 0x219   : > { %1088 = vrot.lane.b32.xlu0 %v1415_v46, %s1621_s13 }
 0x21a   : > { %v1128_v51 = vadd.f32 %v1127_v50, %v1126_v48 }
 0x21b   : > { %1090 = vrot.lane.b32.xlu1 %v1416_v49, %s1621_s13 }
 0x21c   : > { %v1129_v52 = vrot.slane %v1128_v51, 4 }
 0x21e   : > { %v1130_v55 = vadd.f32 %v1129_v52, %v1128_v51 }
 0x220   : > { %v1131_v56 = vrot.slane %v1130_v55, 2 }
 0x222   : > { %v1132_v59 = vadd.f32 %v1131_v56, %v1130_v55 }
 0x224   : > { %v1133_v60 = vrot.slane %v1132_v59, 1 }
 0x226   : > { %v1865_v61 = vadd.f32 %v1133_v60, %v1132_v59 }
 0x228   : > { %v1135_v62 = vmul.f32 0.0078125, %v1865_v61 }
 0x22a   : > { %v1136_v63 = vsub.f32 %v1809_v54, %v1135_v62  ;;  %v1137_v0 = vsub.f32 %v1817_v58, %v1135_v62  ;;  %v1138_v1 = vsub.f32 %v1802_v53, %v1135_v62  ;;  %v1139_v2 = vsub.f32 %v1815_v57, %v1135_v62 }
 0x22b   : > { %v1140_v3 = vsub.f32 %v1837_v6, %v1135_v62  ;;  %v1141_v5 = vsub.f32 %v1845_v11, %v1135_v62  ;;  %v1142_v7 = vsub.f32 %v1833_v4, %v1135_v62  ;;  %v1143_v9 = vsub.f32 %v1841_v8, %v1135_v62 }
 0x22c   : > { %v1144_v10 = vsub.f32 %v950_v22, %v1135_v62  ;;  %v1145_v12 = vsub.f32 %v953_v27, %v1135_v62  ;;  %v1146_v13 = vsub.f32 %v1505_v20, %v1135_v62  ;;  %v1147_v14 = vsub.f32 %v1506_v24, %v1135_v62 }
 0x22d   : > { %v1148_v15 = vsub.f32 %v966_v37, %v1135_v62  ;;  %v1149_v54 = vsub.f32 %v969_v42, %v1135_v62  ;;  %v1150_v16 = vsub.f32 %v1509_v36, %v1135_v62  ;;  %v1151_v58 = vsub.f32 %v1510_v40, %v1135_v62 }
 0x22e   : > { %v1152_v17 = vmul.f32 %v1136_v63, %v1136_v63  ;;  %v1153_v53 = vmul.f32 %v1137_v0, %v1137_v0  ;;  %v1154_v18 = vmul.f32 %v1138_v1, %v1138_v1  ;;  %v1155_v57 = vmul.f32 %v1139_v2, %v1139_v2 }
 0x22f   : > { %v1156_v4 = vmul.f32 %v1140_v3, %v1140_v3  ;;  %v1157_v22 = vmul.f32 %v1141_v5, %v1141_v5  ;;  %v1158_v24 = vmul.f32 %v1142_v7, %v1142_v7  ;;  %v1159_v27 = vmul.f32 %v1143_v9, %v1143_v9 }
 0x230   : > { %v1168_v6 = vsel %vm1097_vm3, %v1152_v17, 0.0  ;;  %v1169_v11 = vsel %vm1097_vm3, %v1153_v53, 0.0  ;;  %v1171_v8 = vsel %vm1097_vm3, %v1154_v18, 0.0  ;;  %v1173_v20 = vsel %vm1097_vm3, %v1155_v57, 0.0 }
 0x231   : > { %v1170_v19 = vadd.f32 %v1169_v11, %v1168_v6  ;;  %v1175_v25 = vsel %vm1097_vm3, %v1156_v4, 0.0  ;;  %v1177_v28 = vsel %vm1097_vm3, %v1157_v22, 0.0  ;;  %v1160_v30 = vmul.f32 %v1144_v10, %v1144_v10 }
 0x232   : > { %v1179_v31 = vsel %vm1097_vm3, %v1158_v24, 0.0  ;;  %v1161_v33 = vmul.f32 %v1145_v12, %v1145_v12  ;;  %v1181_v34 = vsel %vm1097_vm3, %v1159_v27, 0.0  ;;  %v1162_v36 = vmul.f32 %v1146_v13, %v1146_v13 }
 0x233   : > { %v1172_v21 = vadd.f32 %v1171_v8, %v1170_v19  ;;  %v1183_v37 = vsel %vm1097_vm3, %v1160_v30, 0.0  ;;  %v1163_v39 = vmul.f32 %v1147_v14, %v1147_v14  ;;  %v1164_v42 = vmul.f32 %v1148_v15, %v1148_v15 }
 0x234   : > { %v1185_v40 = vsel %vm1097_vm3, %v1161_v33, 0.0  ;;  %v1187_v43 = vsel %vm1097_vm3, %v1162_v36, 0.0  ;;  %v1165_v45 = vmul.f32 %v1149_v54, %v1149_v54  ;;  %v1166_v48 = vmul.f32 %v1150_v16, %v1150_v16 }
 0x235   : > { %v1174_v23 = vadd.f32 %v1173_v20, %v1172_v21  ;;  %v1189_v46 = vsel %vm1097_vm3, %v1163_v39, 0.0  ;;  %v1191_v49 = vsel %vm1097_vm3, %v1164_v42, 0.0  ;;  %v1167_v51 = vmul.f32 %v1151_v58, %v1151_v58 }
 0x236   : > { %v1193_v52 = vsel %vm1097_vm3, %v1165_v45, 0.0  ;;  %v1195_v56 = vsel %vm1097_vm3, %v1166_v48, 0.0 }
 0x237   : > { %v1176_v26 = vadd.f32 %v1175_v25, %v1174_v23  ;;  %v1197_v60 = vsel %vm1097_vm3, %v1167_v51, 0.0 }
 0x239   : > { %v1178_v29 = vadd.f32 %v1177_v28, %v1176_v26 }
 0x23b   : > { %v1180_v32 = vadd.f32 %v1179_v31, %v1178_v29 }
 0x23d   : > { %v1182_v35 = vadd.f32 %v1181_v34, %v1180_v32 }
 0x23f   : > { %v1184_v38 = vadd.f32 %v1183_v37, %v1182_v35 }
 0x241   : > { %v1186_v41 = vadd.f32 %v1185_v40, %v1184_v38 }
 0x243   : > { %v1188_v44 = vadd.f32 %v1187_v43, %v1186_v41 }
 0x245   : > { %v1190_v47 = vadd.f32 %v1189_v46, %v1188_v44 }
 0x247   : > { %v1192_v50 = vadd.f32 %v1191_v49, %v1190_v47 }
 0x249   : > { %v1194_v55 = vadd.f32 %v1193_v52, %v1192_v50 }
 0x24b   : > { %v1196_v59 = vadd.f32 %v1195_v56, %v1194_v55 }
 0x24d   : > { %v1198_v62 = vadd.f32 %v1197_v60, %v1196_v59 }
 0x24f   : > { %v1199_v63 = vrot.slane %v1198_v62, 4 }
 0x251   : > { %v1200_v0 = vadd.f32 %v1199_v63, %v1198_v62 }
 0x253   : > { %v1201_v1 = vrot.slane %v1200_v0, 2 }
 0x255   : > { %v1202_v3 = vadd.f32 %v1201_v1, %v1200_v0 }
 0x256   : > { %v1005_v2 = vpop.permute.xlu0 %1004 }
 0x257   : > { %1011 = vst.msk [vmem:[%s1807_s6] sm:$0xf] %vm1010_vm5, %v1005_v2  ;;  %v1203_v5 = vrot.slane %v1202_v3, 1 }
 0x259   : > { %v1204_v9 = vadd.f32 %v1203_v5, %v1202_v3 }
 0x25a   : > { %v1007_v7 = vpop.permute.xlu0 %1006 }
 0x25b   : > { %1012 = vst.msk [vmem:[%s1807_s6 + $0x4] sm:$0xf] %vm1010_vm5, %v1007_v7  ;;  %v1206_v10 = vsel %vm1205_vm6, %v1865_v61, %v1204_v9 }
 0x25c   : > { %1208 = vst.msk [vmem:[%s214_s19] sm:$0x3] %vm1207_vm7, %v1206_v10 }
 0x266   : > { %v1033_v15 = vpop.permute.xlu0 %1032 }
 0x267   : > { %v1019_v12 = vpop.permute.xlu1 %1018 }
 0x268   : > { %1025 = vst.msk [vmem:[%s1807_s6] sm:$0xf] %vm1024_vm8, %v1019_v12 }
 0x269   : > { %1039 = vst.msk [vmem:[%s1807_s6] sm:$0xf] %vm1038_vm9, %v1033_v15 }
 0x26b   : > { %v1035_v13 = vpop.permute.xlu1 %1034 }
 0x26f   : > { %v1021_v14 = vpop.permute.xlu1 %1020 }
 0x270   : > { %1026 = vst.msk [vmem:[%s1807_s6 + $0x4] sm:$0xf] %vm1024_vm8, %v1021_v14 }
 0x271   : > { %1040 = vst.msk [vmem:[%s1807_s6 + $0x4] sm:$0xf] %vm1038_vm9, %v1035_v13 }
 0x276   : > { %v1061_v54 = vpop.permute.xlu0 %1060 }
 0x278   : > { %v1063_v16 = vpop.permute.xlu1 %1062 }
 0x27a   : > { %v1047_v61 = vpop.permute.xlu0 %1046 }
 0x27b   : > { %1053 = vst.msk [vmem:[%s1807_s6] sm:$0xf] %vm1052_vm10, %v1047_v61 }
 0x27c   : > { %v1049_v58 = vpop.permute.xlu1 %1048  ;;  %1067 = vst.msk [vmem:[%s1807_s6] sm:$0xf] %vm1066_vm11, %v1061_v54 }
 0x27d   : > { %1054 = vst.msk [vmem:[%s1807_s6 + $0x4] sm:$0xf] %vm1052_vm10, %v1049_v58 }
 0x27e   : > { %1068 = vst.msk [vmem:[%s1807_s6 + $0x4] sm:$0xf] %vm1066_vm11, %v1063_v16 }
 0x287   : > { %v1075_v17 = vpop.permute.xlu0 %1074 }
 0x288   : > { %1081 = vst.msk [vmem:[%s1807_s6] sm:$0xf] %vm1080_vm12, %v1075_v17 }
 0x289   : > { %v1077_v53 = vpop.permute.xlu1 %1076 }
 0x28a   : > { %1082 = vst.msk [vmem:[%s1807_s6 + $0x4] sm:$0xf] %vm1080_vm12, %v1077_v53 }
 0x28b   : > { %v1089_v18 = vpop.permute.xlu0 %1088 }
 0x28c   : > { %1095 = vst.msk [vmem:[%s1807_s6] sm:$0xf] %vm1094_vm13, %v1089_v18 }
 0x28d   : > { %v1091_v57 = vpop.permute.xlu1 %1090 }
 0x28e   : > { %1096 = vst.msk [vmem:[%s1807_s6 + $0x4] sm:$0xf] %vm1094_vm13, %v1091_v57 }
 0x28f PF: > { %s15_s15 = sadd.s32 1, %s1612_s15  }
 0x290   : > { %p12_p6 = scmp.ge.s32.totalorder %s15_s15, 6  }
 0x292   :  { %14 = sbr.rel (!%p12_p6) target bundleno = 1 (0x1), region = 74 }

// kernel: pyconv2d_forward.3
= control target key start
LH: loop header
LB: loop body
LE: loop exit
PB: predicated region body
PF: predicated region fallthrough
CT: control target
= control target key end

     0   :  { %s163_s0 = inlined_call_operand.vmem [shape: bf16[64,128], index: 0, kind: input, shape index: {}]   ;;  %s164_s1 = inlined_call_operand.vmem [shape: f32[1,128], index: 1, kind: input, shape index: {}]   ;;  %s165_s2 = inlined_call_operand.vmem [shape: f32[1,128], index: 2, kind: input, shape index: {}]   ;;  %s166_s3 = inlined_call_operand.vmem [shape: f32[64,128], index: 3, kind: output, shape index: {}]  }
   0x1   :  { %v83_v0 = vld [vmem:[%s163_s0] sm:$0xff]   ;;  %v98_v4 = vld [vmem:[%s163_s0 + $0x8] sm:$0xff]   ;;  %v99_v5 = vld [vmem:[%s163_s0 + $0x10] sm:$0xff]  }
   0x2   :  { %v80_v1 = vld [vmem:[%s164_s1] ss:$0 sm:$0xff]  ;;  %v84_v2 = vunpack.c.l.bf16 %v83_v0  ;;  %v85_v3 = vunpack.c.h.bf16 %v83_v0  ;;  %v100_v6 = vld [vmem:[%s163_s0 + $0x18] sm:$0xff]   ;;  %v88_v8 = vunpack.c.l.bf16 %v98_v4  ;;  %v89_v9 = vunpack.c.h.bf16 %v98_v4 }
   0x3   :  { %v81_v7 = vld [vmem:[%s165_s2] ss:$0 sm:$0xff]  ;;  %v92_v10 = vunpack.c.l.bf16 %v99_v5  ;;  %v93_v11 = vunpack.c.h.bf16 %v99_v5  ;;  %v96_v14 = vunpack.c.l.bf16 %v100_v6  ;;  %v97_v15 = vunpack.c.h.bf16 %v100_v6 }
   0x4   :  { %v37_v12 = vmul.f32 %v84_v2, %v80_v1  ;;  %v38_v13 = vmul.f32 %v85_v3, %v80_v1  ;;  %v39_v16 = vmul.f32 %v88_v8, %v80_v1  ;;  %v40_v17 = vmul.f32 %v89_v9, %v80_v1 }
   0x5   :  { %v41_v18 = vmul.f32 %v92_v10, %v80_v1  ;;  %v42_v19 = vmul.f32 %v93_v11, %v80_v1  ;;  %v43_v22 = vmul.f32 %v96_v14, %v80_v1  ;;  %v44_v23 = vmul.f32 %v97_v15, %v80_v1 }
   0x6   :  { %v52_v20 = vadd.f32 %v81_v7, %v37_v12  ;;  %v53_v21 = vadd.f32 %v81_v7, %v38_v13  ;;  %v54_v24 = vadd.f32 %v81_v7, %v39_v16  ;;  %v55_v25 = vadd.f32 %v81_v7, %v40_v17 }
   0x7   :  { %v56_v26 = vadd.f32 %v81_v7, %v41_v18  ;;  %v57_v27 = vadd.f32 %v81_v7, %v42_v19  ;;  %v58_v30 = vadd.f32 %v81_v7, %v43_v22  ;;  %v59_v31 = vadd.f32 %v81_v7, %v44_v23 }
   0x8   :  { %v60_v28 = vmax.f32 %v52_v20, 0.0  ;;  %v61_v29 = vmax.f32 %v53_v21, 0.0  ;;  %v62_v32 = vmax.f32 %v54_v24, 0.0  ;;  %v63_v33 = vmax.f32 %v55_v25, 0.0 }
   0x9   :  { %v64_v34 = vmax.f32 %v56_v26, 0.0  ;;  %v65_v35 = vmax.f32 %v57_v27, 0.0  ;;  %v66_v36 = vmax.f32 %v58_v30, 0.0  ;;  %v67_v37 = vmax.f32 %v59_v31, 0.0 }
   0xa   :  { %68 = vst [vmem:[%s166_s3] sm:$0xff] %v60_v28  ;;  %69 = vst [vmem:[%s166_s3 + $0x8] sm:$0xff] %v61_v29 }
   0xb   :  { %70 = vst [vmem:[%s166_s3 + $0x10] sm:$0xff] %v62_v32  ;;  %71 = vst [vmem:[%s166_s3 + $0x18] sm:$0xff] %v63_v33 }
   0xc   :  { %72 = vst [vmem:[%s166_s3 + $0x20] sm:$0xff] %v64_v34  ;;  %73 = vst [vmem:[%s166_s3 + $0x28] sm:$0xff] %v65_v35 }
   0xd   :  { %74 = vst [vmem:[%s166_s3 + $0x30] sm:$0xff] %v66_v36  ;;  %75 = vst [vmem:[%s166_s3 + $0x38] sm:$0xff] %v67_v37 }

</bundles_post_ra>
